<compile_context>
chip_gen: v5e
topology: v5e:2x2
jax: 0.10.0
libtpu: 0.0.40
codegen_flags: <defaults>
</compile_context>

<pallas_src>
import jax
import jax.numpy as jnp
from jax.experimental import pallas as pl
from jax.experimental.pallas import tpu as pltpu


def _round_up(n, m):
    return ((n + m - 1) // m) * m


# ----------------------------- Pallas kernel --------------------------------

def make_gin_kernel(num_layers):
    """Per-graph-block fused kernel: (GINConv+ReLU) x L -> add-pool -> FC -> log_softmax."""

    def kernel(*refs):
        x_ref, adj_ref, mask_ref = refs[0], refs[1], refs[2]
        layer_refs = refs[3:3 + 2 * num_layers]                    # (w, b) per layer
        wfc_ref, bfc_ref, out_ref = refs[3 + 2 * num_layers:]

        adj = adj_ref[...]                                         # [GB, Nmax, Nmax] bf16
        h = x_ref[...]                                             # [GB, Nmax, Fpad] bf16

        for li in range(num_layers):
            w_ref, b_ref = layer_refs[2 * li], layer_refs[2 * li + 1]
            # GIN aggregation: ((1+eps) I + A) @ h  (block-diagonal -> per-graph matmul)
            agg = jnp.einsum('gij,gjf->gif', adj, h,
                             preferred_element_type=jnp.float32)
            # nn(agg) = Linear (bf16 operands, f32 accumulation) + ReLU
            h = jnp.einsum('gif,fo->gio', agg.astype(jnp.bfloat16), w_ref[...],
                           preferred_element_type=jnp.float32) + b_ref[...]
            h = jnp.maximum(h, 0.0).astype(jnp.bfloat16)

        # global_add_pool: masked row-sum over (valid) nodes of this graph block.
        pooled = jnp.einsum('gxn,gnf->gxf', mask_ref[...], h,
                            preferred_element_type=jnp.float32)     # [GB, 1, Hpad]
        logits = jnp.einsum('gxf,fc->gxc', pooled.astype(jnp.bfloat16), wfc_ref[...],
                            preferred_element_type=jnp.float32) + bfc_ref[...]

        # log_softmax(dim=1); padded class columns carry -1e9 bias -> exp underflows to 0.
        m = jnp.max(logits, axis=-1, keepdims=True)
        z = logits - m
        lse = jnp.log(jnp.sum(jnp.exp(z), axis=-1, keepdims=True))
        out_ref[...] = z - lse

    return kernel


# ------------------------------ Wrapper --------------------------------------

def gin_graph_classifier(x, edge_index, batch, params, num_graphs, eps=0.0,
                         graphs_per_block=1):
    """Forward pass. Per-graph blocking / padding glue in plain JAX, compute in Pallas."""
    N, Fin = x.shape
    layers = params["layers"]
    num_layers = len(layers)
    wfc, bfc = params["fc_w"], params["fc_b"]
    Hid, C = wfc.shape
    G = num_graphs

    LANE = 128
    Fpad = _round_up(Fin, LANE)
    Hpad = _round_up(Hid, LANE)
    Cpad = _round_up(C, LANE)

    # ---- per-graph blocking (exploits block-diagonal batched adjacency) ----
    counts = jnp.zeros((G,), jnp.int32).at[batch].add(1)
    Nmax = int(_round_up(int(jnp.max(counts)), 8))                  # sublane-friendly
    offsets = jnp.concatenate(
        [jnp.zeros((1,), jnp.int32), jnp.cumsum(counts)[:-1].astype(jnp.int32)])
    node_local = jnp.arange(N, dtype=jnp.int32) - offsets[batch]

    GB = graphs_per_block
    Gpad = _round_up(G, GB)
    num_blocks = Gpad // GB

    # node features, zero-padded to [Gpad, Nmax, Fpad]
    x_pad = jnp.zeros((N, Fpad), jnp.float32).at[:, :Fin].set(x.astype(jnp.float32))
    x_blk = jnp.zeros((Gpad, Nmax, Fpad), jnp.float32).at[batch, node_local].set(x_pad)
    x_blk = x_blk.astype(jnp.bfloat16)

    # per-graph augmented adjacency ((1+eps)*I + A); entries are small exact ints -> bf16
    src, dst = edge_index[0], edge_index[1]
    eg = batch[dst]                                  # graph id of each edge
    adj_blk = jnp.zeros((Gpad, Nmax, Nmax), jnp.float32)
    adj_blk = adj_blk.at[eg, node_local[dst], node_local[src]].add(1.0)
    adj_blk = adj_blk.at[batch, node_local, node_local].add(1.0 + eps)
    adj_blk = adj_blk.astype(jnp.bfloat16)

    # node-validity mask used as the add-pool row vector
    mask_blk = jnp.zeros((Gpad, 1, Nmax), jnp.float32).at[batch, 0, node_local].set(1.0)
    mask_blk = mask_blk.astype(jnp.bfloat16)

    # ---- weights, padded to 128 lanes; bf16 operands, f32 biases ----
    def pad2(w, r, c):
        return jnp.zeros((r, c), w.dtype).at[:w.shape[0], :w.shape[1]].set(w)

    dims = [Fpad] + [Hpad] * num_layers
    w_args, w_specs = [], []
    for li, (w, b) in enumerate(layers):
        wp = pad2(w, dims[li], dims[li + 1]).astype(jnp.bfloat16)
        bp = pad2(b.reshape(1, -1), 1, dims[li + 1]).astype(jnp.float32)
        w_args += [wp, bp]
        w_specs += [pl.BlockSpec(wp.shape, lambda g: (0, 0)),
                    pl.BlockSpec(bp.shape, lambda g: (0, 0))]

    wfc_p = pad2(wfc, Hpad, Cpad).astype(jnp.bfloat16)
    # padded class columns: zero weights + -1e9 bias -> exp() underflows, no softmax leak
    bfc_p = jnp.full((1, Cpad), -1e9, jnp.float32).at[0, :C].set(bfc.reshape(-1))

    in_specs = [
        pl.BlockSpec((GB, Nmax, Fpad), lambda g: (g, 0, 0)),
        pl.BlockSpec((GB, Nmax, Nmax), lambda g: (g, 0, 0)),
        pl.BlockSpec((GB, 1, Nmax),    lambda g: (g, 0, 0)),
    ] + w_specs + [
        pl.BlockSpec(wfc_p.shape, lambda g: (0, 0)),
        pl.BlockSpec(bfc_p.shape, lambda g: (0, 0)),
    ]
    out_specs = pl.BlockSpec((GB, 1, Cpad), lambda g: (g, 0, 0))

    # VMEM budget: double-buffered per-graph tiles + resident weights + headroom,
    # capped below the v7x 64 MiB per-TC ceiling (plenty of room on v5e/v6e).
    tile_bytes = GB * (Nmax * Nmax + Nmax * Fpad + Nmax) * 2 + GB * Cpad * 4
    resident_bytes = (sum(int(a.size) * a.dtype.itemsize for a in w_args)
                      + int(wfc_p.size) * 2 + int(bfc_p.size) * 4)
    vmem_limit = int(min(48 * 1024 * 1024,
                         max(8 * 1024 * 1024,
                             4 * tile_bytes + resident_bytes + (2 << 20))))

    out = pl.pallas_call(
        make_gin_kernel(num_layers),
        out_shape=jax.ShapeDtypeStruct((Gpad, 1, Cpad), jnp.float32),
        grid=(num_blocks,),
        in_specs=in_specs,
        out_specs=out_specs,
        compiler_params=pltpu.CompilerParams(
            dimension_semantics=("parallel",),    # independent graphs -> megacore on v7x
            vmem_limit_bytes=vmem_limit),
    )(x_blk, adj_blk, mask_blk, *w_args, wfc_p, bfc_p)

    return out.reshape(Gpad, Cpad)[:G, :C]


# ------------------------- Pure-JAX reference (f32) ---------------------------

def reference_forward(x, edge_index, batch, params, num_graphs, eps=0.0):
    N = x.shape[0]
    src, dst = edge_index[0], edge_index[1]
    adj = jnp.zeros((N, N), jnp.float32).at[dst, src].add(1.0)
    adj = adj + (1.0 + eps) * jnp.eye(N, dtype=jnp.float32)
    h = x.astype(jnp.float32)
    for (w, b) in params["layers"]:
        h = jnp.maximum(adj @ h @ w + b, 0.0)
    pool = (batch[None, :] == jnp.arange(num_graphs)[:, None]).astype(jnp.float32)
    logits = pool @ h @ params["fc_w"] + params["fc_b"]
    return jax.nn.log_softmax(logits, axis=1)


# ------------------------------ Parameter init -------------------------------

def init_params(key, in_channels, hidden_channels, out_channels, num_layers):
    params = {"layers": []}
    dims = [in_channels] + [hidden_channels] * num_layers
    for li in range(num_layers):
        k, key = jax.random.split(key)
        w = jax.random.normal(k, (dims[li], dims[li + 1]), jnp.float32) * 0.1
        b = jnp.zeros((1, dims[li + 1]), jnp.float32)
        params["layers"].append((w, b))
    kf, key = jax.random.split(key)
    params["fc_w"] = jax.random.normal(kf, (hidden_channels, out_channels), jnp.float32) * 0.1
    params["fc_b"] = jnp.zeros((1, out_channels), jnp.float32)
    return params


# --------------------------------- Main ---------------------------------------

if __name__ == "__main__":
    key = jax.random.PRNGKey(0)

    # small deterministic batch: 2 graphs of 8 nodes each (N = 16)
    N_PER_G, G = 8, 2
    N = N_PER_G * G
    IN_CH, HID, OUT_CH, NUM_LAYERS = 8, 32, 4, 2

    kx, kp = jax.random.split(key)
    x = jax.random.normal(kx, (N, IN_CH), jnp.float32)

    # bidirectional ring within each graph
    src_list, dst_list = [], []
    for g in range(G):
        base = g * N_PER_G
        for i in range(N_PER_G):
            a = base + i
            b = base + (i + 1) % N_PER_G
            src_list += [a, b]
            dst_list += [b, a]
    edge_index = jnp.array([src_list, dst_list], jnp.int32)
    batch = jnp.repeat(jnp.arange(G, dtype=jnp.int32), N_PER_G)

    params = init_params(kp, IN_CH, HID, OUT_CH, NUM_LAYERS)

    out = gin_graph_classifier(x, edge_index, batch, params, num_graphs=G)
    out = jax.block_until_ready(out)
    ref = jax.block_until_ready(reference_forward(x, edge_index, batch, params, G))

    assert out.shape == (G, OUT_CH)
    assert bool(jnp.all(jnp.isfinite(out)))
    # rows of log_softmax should exp-sum to 1
    assert bool(jnp.allclose(jnp.sum(jnp.exp(out), axis=1), 1.0, atol=1e-4))
    # bf16 operands / f32 accumulation vs f32 reference
    assert bool(jnp.allclose(out, ref, atol=5e-2, rtol=5e-2))
    print("KERNEL_OK")
</pallas_src>

<mosaic_0001>
module attributes {stable_mosaic.version = 11 : i64} {
  func.func @kernel(%arg0: i32, %arg1: memref<1x8x128xbf16, #tpu.memory_space<vmem>>, %arg2: memref<1x8x8xbf16, #tpu.memory_space<vmem>>, %arg3: memref<1x1x8xbf16, #tpu.memory_space<vmem>>, %arg4: memref<128x128xbf16, #tpu.memory_space<vmem>>, %arg5: memref<1x128xf32, #tpu.memory_space<vmem>>, %arg6: memref<128x128xbf16, #tpu.memory_space<vmem>>, %arg7: memref<1x128xf32, #tpu.memory_space<vmem>>, %arg8: memref<128x128xbf16, #tpu.memory_space<vmem>>, %arg9: memref<1x128xf32, #tpu.memory_space<vmem>>, %arg10: memref<1x1x128xf32, #tpu.memory_space<vmem>>) attributes {dimension_semantics = [#tpu.dimension_semantics<parallel>], iteration_bounds = array<i64: 2>, scalar_prefetch = 0 : i64, scratch_operands = 0 : i64, tpu.core_type = #tpu.core_type<tc>, window_params = [{transform_indices = @transform_0, window_bounds = array<i64: 1, 8, 128>}, {transform_indices = @transform_1, window_bounds = array<i64: 1, 8, 8>}, {transform_indices = @transform_2, window_bounds = array<i64: 1, 1, 8>}, {pipeline_mode = #tpu.pipeline_mode<synchronous>, transform_indices = @transform_3, window_bounds = array<i64: 128, 128>}, {pipeline_mode = #tpu.pipeline_mode<synchronous>, transform_indices = @transform_4, window_bounds = array<i64: 1, 128>}, {pipeline_mode = #tpu.pipeline_mode<synchronous>, transform_indices = @transform_5, window_bounds = array<i64: 128, 128>}, {pipeline_mode = #tpu.pipeline_mode<synchronous>, transform_indices = @transform_6, window_bounds = array<i64: 1, 128>}, {pipeline_mode = #tpu.pipeline_mode<synchronous>, transform_indices = @transform_7, window_bounds = array<i64: 128, 128>}, {pipeline_mode = #tpu.pipeline_mode<synchronous>, transform_indices = @transform_8, window_bounds = array<i64: 1, 128>}, {transform_indices = @transform_9, window_bounds = array<i64: 1, 1, 128>}]} {
    %c0 = arith.constant 0 : index
    %c0_0 = arith.constant 0 : index
    %c0_1 = arith.constant 0 : index
    %0 = vector.load %arg2[%c0, %c0_0, %c0_1] : memref<1x8x8xbf16, #tpu.memory_space<vmem>>, vector<1x8x8xbf16>
    %c0_2 = arith.constant 0 : index
    %c0_3 = arith.constant 0 : index
    %c0_4 = arith.constant 0 : index
    %1 = vector.load %arg1[%c0_2, %c0_3, %c0_4] : memref<1x8x128xbf16, #tpu.memory_space<vmem>>, vector<1x8x128xbf16>
    "tpu.trace_start"() <{level = 10 : i32, message = "gij,gjf->gif"}> : () -> ()
    %cst = arith.constant dense<0.000000e+00> : vector<1x8x128xf32>
    %2 = tpu.matmul %0, %1, %cst {dimension_numbers = #tpu.dot_dimension_numbers<[2], [1], [1], [2], [0, 0, 0, 1, 1, 2], [0], [0]>} : vector<1x8x8xbf16>, vector<1x8x128xbf16>, vector<1x8x128xf32> -> vector<1x8x128xf32>
    "tpu.trace_stop"() : () -> ()
    %3 = arith.truncf %2 : vector<1x8x128xf32> to vector<1x8x128xbf16>
    %c0_5 = arith.constant 0 : index
    %c0_6 = arith.constant 0 : index
    %4 = vector.load %arg4[%c0_5, %c0_6] : memref<128x128xbf16, #tpu.memory_space<vmem>>, vector<128x128xbf16>
    "tpu.trace_start"() <{level = 10 : i32, message = "gif,fo->gio"}> : () -> ()
    %cst_7 = arith.constant dense<0.000000e+00> : vector<1x8x128xf32>
    %5 = tpu.matmul %3, %4, %cst_7 {dimension_numbers = #tpu.dot_dimension_numbers<[2], [0], [0, 1], [1], [0, 0, 0, 1, 1, 1], [], []>} : vector<1x8x128xbf16>, vector<128x128xbf16>, vector<1x8x128xf32> -> vector<1x8x128xf32>
    "tpu.trace_stop"() : () -> ()
    %c0_8 = arith.constant 0 : index
    %c0_9 = arith.constant 0 : index
    %6 = vector.load %arg5[%c0_8, %c0_9] : memref<1x128xf32, #tpu.memory_space<vmem>>, vector<1x128xf32>
    %7 = vector.shape_cast %6 : vector<1x128xf32> to vector<1x1x128xf32>
    %8 = vector.broadcast %7 : vector<1x1x128xf32> to vector<1x8x128xf32>
    %9 = arith.addf %5, %8 : vector<1x8x128xf32>
    %cst_10 = arith.constant 0.000000e+00 : f32
    %10 = vector.broadcast %cst_10 : f32 to vector<1x8x128xf32>
    %11 = arith.maximumf %9, %10 : vector<1x8x128xf32>
    %12 = arith.truncf %11 : vector<1x8x128xf32> to vector<1x8x128xbf16>
    "tpu.trace_start"() <{level = 10 : i32, message = "gij,gjf->gif"}> : () -> ()
    %cst_11 = arith.constant dense<0.000000e+00> : vector<1x8x128xf32>
    %13 = tpu.matmul %0, %12, %cst_11 {dimension_numbers = #tpu.dot_dimension_numbers<[2], [1], [1], [2], [0, 0, 0, 1, 1, 2], [0], [0]>} : vector<1x8x8xbf16>, vector<1x8x128xbf16>, vector<1x8x128xf32> -> vector<1x8x128xf32>
    "tpu.trace_stop"() : () -> ()
    %14 = arith.truncf %13 : vector<1x8x128xf32> to vector<1x8x128xbf16>
    %c0_12 = arith.constant 0 : index
    %c0_13 = arith.constant 0 : index
    %15 = vector.load %arg6[%c0_12, %c0_13] : memref<128x128xbf16, #tpu.memory_space<vmem>>, vector<128x128xbf16>
    "tpu.trace_start"() <{level = 10 : i32, message = "gif,fo->gio"}> : () -> ()
    %cst_14 = arith.constant dense<0.000000e+00> : vector<1x8x128xf32>
    %16 = tpu.matmul %14, %15, %cst_14 {dimension_numbers = #tpu.dot_dimension_numbers<[2], [0], [0, 1], [1], [0, 0, 0, 1, 1, 1], [], []>} : vector<1x8x128xbf16>, vector<128x128xbf16>, vector<1x8x128xf32> -> vector<1x8x128xf32>
    "tpu.trace_stop"() : () -> ()
    %c0_15 = arith.constant 0 : index
    %c0_16 = arith.constant 0 : index
    %17 = vector.load %arg7[%c0_15, %c0_16] : memref<1x128xf32, #tpu.memory_space<vmem>>, vector<1x128xf32>
    %18 = vector.shape_cast %17 : vector<1x128xf32> to vector<1x1x128xf32>
    %19 = vector.broadcast %18 : vector<1x1x128xf32> to vector<1x8x128xf32>
    %20 = arith.addf %16, %19 : vector<1x8x128xf32>
    %cst_17 = arith.constant 0.000000e+00 : f32
    %21 = vector.broadcast %cst_17 : f32 to vector<1x8x128xf32>
    %22 = arith.maximumf %20, %21 : vector<1x8x128xf32>
    %23 = arith.truncf %22 : vector<1x8x128xf32> to vector<1x8x128xbf16>
    %c0_18 = arith.constant 0 : index
    %c0_19 = arith.constant 0 : index
    %c0_20 = arith.constant 0 : index
    %24 = vector.load %arg3[%c0_18, %c0_19, %c0_20] : memref<1x1x8xbf16, #tpu.memory_space<vmem>>, vector<1x1x8xbf16>
    "tpu.trace_start"() <{level = 10 : i32, message = "gxn,gnf->gxf"}> : () -> ()
    %cst_21 = arith.constant dense<0.000000e+00> : vector<1x1x128xf32>
    %25 = tpu.matmul %24, %23, %cst_21 {dimension_numbers = #tpu.dot_dimension_numbers<[2], [1], [1], [2], [0, 0, 0, 1, 1, 2], [0], [0]>} : vector<1x1x8xbf16>, vector<1x8x128xbf16>, vector<1x1x128xf32> -> vector<1x1x128xf32>
    "tpu.trace_stop"() : () -> ()
    %26 = arith.truncf %25 : vector<1x1x128xf32> to vector<1x1x128xbf16>
    %c0_22 = arith.constant 0 : index
    %c0_23 = arith.constant 0 : index
    %27 = vector.load %arg8[%c0_22, %c0_23] : memref<128x128xbf16, #tpu.memory_space<vmem>>, vector<128x128xbf16>
    "tpu.trace_start"() <{level = 10 : i32, message = "gxf,fc->gxc"}> : () -> ()
    %cst_24 = arith.constant dense<0.000000e+00> : vector<1x1x128xf32>
    %28 = tpu.matmul %26, %27, %cst_24 {dimension_numbers = #tpu.dot_dimension_numbers<[2], [0], [0, 1], [1], [0, 0, 0, 1, 1, 1], [], []>} : vector<1x1x128xbf16>, vector<128x128xbf16>, vector<1x1x128xf32> -> vector<1x1x128xf32>
    "tpu.trace_stop"() : () -> ()
    %c0_25 = arith.constant 0 : index
    %c0_26 = arith.constant 0 : index
    %29 = vector.load %arg9[%c0_25, %c0_26] : memref<1x128xf32, #tpu.memory_space<vmem>>, vector<1x128xf32>
    %30 = vector.shape_cast %29 : vector<1x128xf32> to vector<1x1x128xf32>
    %31 = arith.addf %28, %30 : vector<1x1x128xf32>
    %cst_27 = arith.constant dense<0xFF800000> : vector<1x1xf32>
    %32 = vector.multi_reduction <maximumf>, %31, %cst_27 [2] : vector<1x1x128xf32> to vector<1x1xf32>
    %33 = vector.shape_cast %32 : vector<1x1xf32> to vector<1x1x1xf32>
    %34 = vector.broadcast %33 : vector<1x1x1xf32> to vector<1x1x128xf32>
    %35 = arith.subf %31, %34 : vector<1x1x128xf32>
    %36 = math.exp %35 : vector<1x1x128xf32>
    %cst_28 = arith.constant dense<0.000000e+00> : vector<1x1xf32>
    %37 = vector.multi_reduction <add>, %36, %cst_28 [2] : vector<1x1x128xf32> to vector<1x1xf32>
    %38 = vector.shape_cast %37 : vector<1x1xf32> to vector<1x1x1xf32>
    %39 = math.log %38 : vector<1x1x1xf32>
    %40 = vector.broadcast %39 : vector<1x1x1xf32> to vector<1x1x128xf32>
    %41 = arith.subf %35, %40 : vector<1x1x128xf32>
    %c0_29 = arith.constant 0 : index
    %c0_30 = arith.constant 0 : index
    %c0_31 = arith.constant 0 : index
    %42 = vector.load %arg10[%c0_29, %c0_30, %c0_31] : memref<1x1x128xf32, #tpu.memory_space<vmem>>, vector<1x1x128xf32>
    tpu.vector_store %arg10[%c0_29, %c0_30, %c0_31], %41 {strides = array<i32>} : memref<1x1x128xf32, #tpu.memory_space<vmem>>, vector<1x1x128xf32>,
    return
  }
  func.func @transform_0(%arg0: i32) -> (i32, i32, i32) {
    %c0_i32 = arith.constant 0 : i32
    %c0_i32_0 = arith.constant 0 : i32
    %c0_i32_1 = arith.constant 0 : i32
    return %arg0, %c0_i32, %c0_i32_0 : i32, i32, i32
  }
  func.func @transform_1(%arg0: i32) -> (i32, i32, i32) {
    %c0_i32 = arith.constant 0 : i32
    %c0_i32_0 = arith.constant 0 : i32
    %c0_i32_1 = arith.constant 0 : i32
    return %arg0, %c0_i32, %c0_i32_0 : i32, i32, i32
  }
  func.func @transform_2(%arg0: i32) -> (i32, i32, i32) {
    %c0_i32 = arith.constant 0 : i32
    %c0_i32_0 = arith.constant 0 : i32
    %c0_i32_1 = arith.constant 0 : i32
    return %arg0, %c0_i32, %c0_i32_0 : i32, i32, i32
  }
  func.func @transform_3(%arg0: i32) -> (i32, i32) {
    %c0_i32 = arith.constant 0 : i32
    %c0_i32_0 = arith.constant 0 : i32
    %c0_i32_1 = arith.constant 0 : i32
    return %c0_i32, %c0_i32_0 : i32, i32
  }
  func.func @transform_4(%arg0: i32) -> (i32, i32) {
    %c0_i32 = arith.constant 0 : i32
    %c0_i32_0 = arith.constant 0 : i32
    %c0_i32_1 = arith.constant 0 : i32
    return %c0_i32, %c0_i32_0 : i32, i32
  }
  func.func @transform_5(%arg0: i32) -> (i32, i32) {
    %c0_i32 = arith.constant 0 : i32
    %c0_i32_0 = arith.constant 0 : i32
    %c0_i32_1 = arith.constant 0 : i32
    return %c0_i32, %c0_i32_0 : i32, i32
  }
  func.func @transform_6(%arg0: i32) -> (i32, i32) {
    %c0_i32 = arith.constant 0 : i32
    %c0_i32_0 = arith.constant 0 : i32
    %c0_i32_1 = arith.constant 0 : i32
    return %c0_i32, %c0_i32_0 : i32, i32
  }
  func.func @transform_7(%arg0: i32) -> (i32, i32) {
    %c0_i32 = arith.constant 0 : i32
    %c0_i32_0 = arith.constant 0 : i32
    %c0_i32_1 = arith.constant 0 : i32
    return %c0_i32, %c0_i32_0 : i32, i32
  }
  func.func @transform_8(%arg0: i32) -> (i32, i32) {
    %c0_i32 = arith.constant 0 : i32
    %c0_i32_0 = arith.constant 0 : i32
    %c0_i32_1 = arith.constant 0 : i32
    return %c0_i32, %c0_i32_0 : i32, i32
  }
  func.func @transform_9(%arg0: i32) -> (i32, i32, i32) {
    %c0_i32 = arith.constant 0 : i32
    %c0_i32_0 = arith.constant 0 : i32
    %c0_i32_1 = arith.constant 0 : i32
    return %arg0, %c0_i32, %c0_i32_0 : i32, i32, i32
  }
}

</mosaic_0001>

<bundles_post_ra>
// kernel: tpu_custom_call.1
= control target key start
LH: loop header
LB: loop body
LE: loop exit
PB: predicated region body
PF: predicated region fallthrough
CT: control target
= control target key end

     0   :  { %s1633_s0 = inlined_call_operand.hbm [shape: bf16[2,8,128], index: 0, kind: input, shape index: {}]   ;;  %s1634_s1 = inlined_call_operand.hbm [shape: bf16[2,8,8], index: 1, kind: input, shape index: {}]   ;;  %s1635_s2 = inlined_call_operand.vmem [shape: bf16[2,1,8], index: 2, kind: input, shape index: {}]   ;;  %s1636_s3 = inlined_call_operand.hbm [shape: bf16[128,128], index: 3, kind: input, shape index: {}]   ;;  %s1637_s4 = inlined_call_operand.vmem [shape: f32[1,128], index: 4, kind: input, shape index: {}]   ;;  %s1638_s5 = inlined_call_operand.hbm [shape: bf16[128,128], index: 5, kind: input, shape index: {}]   ;;  %s1639_s6 = inlined_call_operand.vmem [shape: f32[1,128], index: 6, kind: input, shape index: {}]   ;;  %s1640_s7 = inlined_call_operand.hbm [shape: bf16[128,128], index: 7, kind: input, shape index: {}]   ;;  %s1641_s8 = inlined_call_operand.vmem [shape: f32[1,128], index: 8, kind: input, shape index: {}]   ;;  %s1642_s9 = inlined_call_operand.hbm [shape: f32[2,1,128], index: 9, kind: output, shape index: {}]  }
   0x1   :  { %1648 = sst [smem:[#allocation22_spill]] %s1636_s3 }
   0x2   :  { %1649 = sst [smem:[#allocation23_spill]] %s1638_s5 }
   0x3   :  { %1650 = sst [smem:[#allocation24_spill]] %s1640_s7 }
   0x4   :  { %14 = vsyncpa [#allocation3], 0 }
   0x5   :  { %16 = vsyncpa [#allocation3 + $0x1], 0 }
   0x6   :  { %17 = vsyncpa [#allocation6], 0 }
   0x7   :  { %19 = vsyncpa [#allocation6 + $0x1], 0 }
   0x8   :  { %20 = vsyncpa [#allocation9], 0 }
   0x9   :  { %21 = vsyncpa [#allocation4], 0 }
   0xa   :  { %23 = vsyncpa [#allocation4 + $0x1], 0  ;;  %s1427_s30 = smov 0   ;;  %s1429_s10 = smov 0  }
   0xb   :  { %s1431_s11 = smov 0   ;;  %s1433_s12 = smov 0  }
   0xc LB: > { %1651 = sst [smem:[#allocation17_spill]] %s1366_s11  ;;  %s1451_s16 = sadd.s32 4294967295, %s1370_s12   ;;  %s1370_s12 = sphi %s1433_s12, %s1669_s12   ;;  %s1366_s11 = sphi %s1431_s11, %s1671_s11   ;;  %s1362_s10 = sphi %s1429_s10, %s1673_s10   ;;  %s1358_s30 = sphi %s1427_s30, %s1672_s30  }
   0xd   : > { %1652 = sst [smem:[#allocation18_spill]] %s1370_s12  ;;  %p912_p0 = scmp.ge.s32.totalorder %s1370_s12, 1 }
   0xe   : > { %s1653_s3 = sld [smem:[#allocation22_spill]]  ;;  %p50_p1 = scmp.eq.s32.totalorder %s1451_s16, 0 }
   0xf   : > { %p264_p2 = scmp.lt.s32.totalorder %s1370_s12, 3  ;;  %s1372_s18 = smov [#allocation7]  }
  0x10   : > { %s277_s19 = sshll.u32 %s1372_s18, 4  ;;  %s1655_s5 = sld [smem:[#allocation23_spill]]  ;;  %s278_s19 = int_to_ptr.vmem [resolvable:$true] %s277_s19 }
  0x11   : > { %p1456_p3 = pnand %p912_p0, %p264_p2  ;;  %s1657_s7 = sld [smem:[#allocation24_spill]] }
  0x12   : > { %s1373_s27 = smov [#allocation8]   ;;  %s1374_s29 = smov 64  }
  0x13   : > { %p1070_p4 = pneg %p1456_p3  ;;  %s294_s28 = sshll.u32 %s1373_s27, 4  ;;  %s295_s28 = int_to_ptr.vmem [resolvable:$true] %s294_s28 }
  0x14   : > { %s275_s15 = sshll.u32 %s1653_s3, 4  ;;  %s1375_s13 = smov 4   ;;  %s276_s15 = int_to_ptr.hbm [resolvable:$true] %s275_s15 }
  0x15   : > { %p1468_p6 = pnand %p1070_p4, %p50_p1  ;;  %s1376_s14 = smov [#allocation10]  }
  0x16   : > { %s292_s22 = sshll.u32 %s1655_s5, 4  ;;  %s311_s18 = sshll.u32 %s1376_s14, 4  ;;  %s293_s22 = int_to_ptr.hbm [resolvable:$true] %s292_s22  ;;  %s312_s18 = int_to_ptr.vmem [resolvable:$true] %s311_s18 }
  0x17   : > { %s309_s26 = sshll.u32 %s1657_s7, 4  ;;  %s911_s20 = sadd.s32 4294967294, %s1370_s12   ;;  %s310_s26 = int_to_ptr.hbm [resolvable:$true] %s309_s26 }
  0x18   : > { %1073 = dma.hbm_to_vmem [thread:$0]  (!%p1468_p6), %s276_s15, 1024, %s278_s19, [#allocation6], %s1374_s29, %s1374_s29, %s1375_s13  }
  0x19   : > { %1076 = dma.hbm_to_vmem [thread:$0]  (!%p1468_p6), %s293_s22, 1024, %s295_s28, [#allocation9], %s1374_s29, %s1374_s29, %s1375_s13  }
  0x1a   : > { %1079 = dma.hbm_to_vmem [thread:$0]  (!%p1468_p6), %s310_s26, 1024, %s312_s18, [#allocation9], %s1374_s29, %s1374_s29, %s1375_s13  }
  0x1b   : > { %s1483_s21 = sadd.s32 1, %s1370_s12   ;;  %s36_s24 = sadd.s32 1, %s1366_s11 }
  0x1c   : > { %1658 = sst [smem:[#allocation19_spill]] %s1483_s21  ;;  %s33_s15 = ssub.s32 %s1370_s12, %s1483_s21 }
  0x1d   : > { %p43_p7 = scmp.ne.s32.totalorder %s1366_s11, %s1362_s10  ;;  %p34_p8 = scmp.eq.s32.totalorder %s33_s15, 0 }
  0x1e   : > { %p44_p9 = scmp.eq.s32.totalorder %s1370_s12, 0  ;;  %p49_p10 = scmp.ne.s32.totalorder %s1362_s10, %s1358_s30 }
  0x1f   : > { %p251_p11 = scmp.eq.s32.totalorder %s1451_s16, 1  ;;  %p257_p2 = scmp.eq.s32.totalorder %s911_s20, 1 }
  0x20   : > { %s1495_s19 = scalar_select %p34_p8, %s1366_s11, %s36_s24  }
  0x21   : > { %p1497_p12 = por %p44_p9, %p43_p7  ;;  %p1503_p13 = por %p50_p1, %p49_p10 }
  0x22   : > { %1659 = sst [smem:[#allocation20_spill]] %s1495_s19  ;;  %p1507_p0 = por %p251_p11, %p43_p7 }
  0x23   : > { %p1094_p4 = scmp.lt.s32.totalorder %s1370_s12, 2  ;;  %s328_s26 = sand.u32 1, %s1366_s11  }
  0x24   : > { %p1513_p6 = por %p257_p2, %p49_p10  ;;  %s917_s28 = sshll.u32 %s328_s26, 2 }
  0x25   : > { %s918_s29 = sshll.u32 %s1370_s12, 2  ;;  %s332_s15 = scalar_lea.vmem [#allocation2], %s917_s28 }
  0x26   : > { %s1663_s27 = scalar_select %p1513_p6, 1, 0 }
  0x27   : > { %s336_s18 = scalar_lea.hbm %s1633_s0, %s918_s29  ;;  %s340_s3 = sshll.u32 %s332_s15, 4  ;;  %s341_s3 = int_to_ptr.vmem [resolvable:$true] %s340_s3 }
  0x28   : > { %1664 = sst [smem:[#allocation21_spill]] %s1663_s27  ;;  %s338_s24 = sshll.u32 %s336_s18, 4  ;;  %s339_s24 = int_to_ptr.hbm [resolvable:$true] %s338_s24 }
  0x29   : > { %p1523_p7 = pnand %p1094_p4, %p1497_p12  ;;  %s355_s19 = scalar_lea.hbm %s1634_s1, %s918_s29 }
  0x2a   : > { %s347_s11 = sand.u32 1, %s1370_s12   ;;  %s329_s21 = scalar_lea.sflag [#allocation3], %s328_s26 }
  0x2b   : > { %s1232_s13 = sshra.s32 %s339_s24, 4  ;;  %p1236_p9 = pneg %p1523_p7  ;;  %s1233_s13 = int_to_ptr.hbm [resolvable:$true] %s1232_s13 }
  0x2c   : > { %s1234_s14 = scalar_lea.hbm %s1233_s13, 4  ;;  %s1239_s15 = scalar_lea.hbm %s1633_s0, 8 }
  0x2d   : > { %p1235_p8 = scmp.ne.s32.totalorder %s1233_s13, %s1234_s14  ;;  %p1240_p12 = scmp.lt.s32.totalorder %s1233_s13, %s1633_s0 }
  0x2e   : > { %p1241_p2 = scmp.lt.s32.totalorder %s1239_s15, %s1234_s14 }
  0x2f   : > { %p1237_p10 = pnand %p1236_p9, %p1235_p8 }
  0x30   : > { %p1242_p4 = por %p1241_p2, %p1240_p12 }
  0x31   : > { %p1238_p11 = pneg %p1237_p10 }
  0x33   : > { %p1243_p5 = pnand %p1242_p4, %p1238_p11 }
  0x35   : > { %1246 = shalt.err (!%p1243_p5)
}
  0x36   : > { %1083 = dma.hbm_to_vmem [thread:$0]  (!%p1523_p7), %s339_s24, 64, %s341_s3, %s329_s21  }
  0x37   : > { %s357_s26 = sshll.u32 %s355_s19, 4  ;;  %s351_s29 = scalar_lea.vmem [#allocation5], %s917_s28  ;;  %s358_s26 = int_to_ptr.hbm [resolvable:$true] %s357_s26 }
  0x38   : > { %s359_s12 = sshll.u32 %s351_s29, 4  ;;  %s348_s27 = scalar_lea.sflag [#allocation6], %s347_s11  ;;  %s360_s12 = int_to_ptr.vmem [resolvable:$true] %s359_s12 }
  0x39   : > { %s1262_s22 = sshra.s32 %s358_s26, 4  ;;  %s1269_s15 = scalar_lea.hbm %s1634_s1, 8  ;;  %s1263_s22 = int_to_ptr.hbm [resolvable:$true] %s1262_s22 }
  0x3a   : > { %s1264_s18 = scalar_lea.hbm %s1263_s22, 4  ;;  %p1270_p5 = scmp.lt.s32.totalorder %s1263_s22, %s1634_s1 }
  0x3b   : > { %p1265_p8 = scmp.ne.s32.totalorder %s1263_s22, %s1264_s18  ;;  %p1271_p11 = scmp.lt.s32.totalorder %s1269_s15, %s1264_s18 }
  0x3d   : > { %p1267_p10 = pnand %p1265_p8, %p1236_p9  ;;  %p1272_p2 = por %p1271_p11, %p1270_p5 }
  0x3f   : > { %p1268_p12 = pneg %p1267_p10 }
  0x41   : > { %p1273_p4 = pnand %p1272_p2, %p1268_p12 }
  0x43   : > { %1276 = shalt.err (!%p1273_p4)
}
  0x44   : > { %1086 = dma.hbm_to_vmem [thread:$0]  (!%p1523_p7), %s358_s26, 64, %s360_s12, %s348_s27  }
  0x45   : > { %374 = sbr.rel (%p1456_p3) target bundleno = 1148 (0x47c), region = 56  ;;  %s1558_s11 = sand.u32 (!%p1456_p3), 1, %s1362_s10  }
  0x46   : > { %s922_s21 = sshll.u32 (!%p1456_p3), %s1558_s11, 2  ;;  %s377_s19 = scalar_lea.sflag (!%p1456_p3), [#allocation3], %s1558_s11 }
  0x47   : > { %s380_s28 = scalar_lea.vmem (!%p1456_p3), [#allocation2], %s922_s21 }
  0x4a   : > { %1337 = dma.done.wait (%p1503_p13), %s377_s19, 64  }
  0x4b   : > { %1339 = vsyncadd (%p1503_p13), %s377_s19, 4294967232  ;;  %s386_s12 = sand.u32 1, %s1451_s16   ;;  %s390_s17 = scalar_lea.vmem [#allocation5], %s922_s21 }
  0x4c   : > { %s387_s27 = scalar_lea.sflag [#allocation6], %s386_s12 }
  0x4d   : > { %1341 = dma.done.wait (%p1503_p13), %s387_s27, 64  }
  0x4e   : > { %1343 = vsyncadd (%p1503_p13), %s387_s27, 4294967232 }
  0x4f   : > { %1345 = dma.done.wait (%p50_p1), [#allocation6], 1024  }
  0x50   : > { %1347 = vsyncadd (%p50_p1), [#allocation6], 4294966272 }
  0x51   : > { %1349 = dma.done.wait (%p50_p1), [#allocation9], 2048  }
  0x52   : > { %1351 = vsyncadd (%p50_p1), [#allocation9], 4294965248  ;;  %vm458_vm0 = vcmask 1043456   ;;  %v453_v0 = vld [vmem:[%s380_s28] sm:$0xf]  ;;  %v1035_v1 = vld [vmem:[#allocation7 + $0x38] sm:$0xff]  ;;  %s781_s3 = scalar_lea.hbm %s1642_s9, %s1451_s16 }
  0x53   : > { %v460_v2 = vsel %vm458_vm0, %v453_v0, 0  ;;  %v452_v3 = vld [vmem:[%s390_s17] sm:$0xf]  ;;  %vm454_vm1 = vcmask 64512   ;;  %544 = vmatpush.bf16.msra.mxu1 %v1035_v1  ;;  %v1034_v4 = vld [vmem:[#allocation7 + $0x30] sm:$0xff]  ;;  %v1033_v5 = vld [vmem:[#allocation7 + $0x28] sm:$0xff] }
  0x54   : > { %469 = vmatpush.bf16.msra.mxu0 %v460_v2  ;;  %v1032_v6 = vld [vmem:[#allocation7 + $0x20] sm:$0xff]  ;;  %v1031_v7 = vld [vmem:[#allocation7 + $0x18] sm:$0xff]  ;;  %v1030_v8 = vld [vmem:[#allocation7 + $0x10] sm:$0xff]  ;;  %p448_p1 = scmp.lt.s32.totalorder %s1451_s16, 1  ;;  %vm758_vm2 = vcmask 1040384   ;;  %s447_s21 = scalar_lea.vmem [#allocation11], %s1558_s11 }
  0x55   : > { %v1029_v9 = vld [vmem:[#allocation7 + $0x8] sm:$0xff]  ;;  %v1028_v10 = vld [vmem:[#allocation7] sm:$0xff]  ;;  %v1043_v14 = vld [vmem:[#allocation8 + $0x38] sm:$0xff]  ;;  %s783_s19 = sshll.u32 %s447_s21, 4  ;;  %s785_s28 = sshll.u32 %s781_s3, 4  ;;  %s784_s19 = int_to_ptr.vmem [resolvable:$true] %s783_s19  ;;  %s786_s28 = int_to_ptr.hbm [resolvable:$true] %s785_s28 }
  0x56   : > { %644 = vmatpush.bf16.msra.mxu3 %v1043_v14  ;;  %v1042_v15 = vld [vmem:[#allocation8 + $0x30] sm:$0xff]  ;;  %v1041_v16 = vld [vmem:[#allocation8 + $0x28] sm:$0xff]  ;;  %v1040_v17 = vld [vmem:[#allocation8 + $0x20] sm:$0xff]  ;;  %s449_s26 = scalar_select %p448_p1, %s1451_s16, 1 }
  0x57   : > { %927 = vmatmul.msk.bf16.vlgmr.msra.gmra.mxu0 %vm454_vm1, %v452_v3  ;;  %545 = vmatpush.bf16.msra.mxu1 %v1034_v4  ;;  %v1039_v18 = vld [vmem:[#allocation8 + $0x18] sm:$0xff]  ;;  %v1136_v19 = vld [vmem:[%s1637_s4] ss:$0 sm:$0xff]  ;;  %v1037_v23 = vld [vmem:[#allocation8 + $0x8] sm:$0xff]  ;;  %s773_s12 = scalar_lea.sflag [#allocation4], %s1558_s11  ;;  %s1306_s27 = sshra.s32 %s786_s28, 4  ;;  %s1307_s27 = int_to_ptr.hbm [resolvable:$true] %s1306_s27 }
  0x58   : > { %v1038_v20 = vld [vmem:[#allocation8 + $0x10] sm:$0xff]  ;;  %v1036_v28 = vld [vmem:[#allocation8] sm:$0xff]  ;;  %v1051_v32 = vld [vmem:[#allocation10 + $0x38] sm:$0xff]  ;;  %s450_s18 = scalar_lea.vmem %s1635_s2, %s449_s26  ;;  %s1308_s17 = scalar_lea.hbm %s1307_s27, 1 }
  0x59   : > { %v1050_v33 = vld [vmem:[#allocation10 + $0x30] sm:$0xff]  ;;  %v1049_v34 = vld [vmem:[#allocation10 + $0x28] sm:$0xff]  ;;  %v1048_v35 = vld [vmem:[#allocation10 + $0x20] sm:$0xff]  ;;  %p1309_p3 = scmp.ne.s32.totalorder %s1307_s27, %s1308_s17  ;;  %s1312_s16 = scalar_lea.hbm %s1642_s9, 2 }
  0x5a   : > { %645 = vmatpush.bf16.msra.mxu3 %v1042_v15  ;;  %v1047_v36 = vld [vmem:[#allocation10 + $0x18] sm:$0xff]  ;;  %v1137_v37 = vld [vmem:[%s1639_s6] ss:$0 sm:$0xff]  ;;  %v1045_v41 = vld [vmem:[#allocation10 + $0x8] sm:$0xff]  ;;  %p1313_p9 = scmp.lt.s32.totalorder %s1307_s27, %s1642_s9  ;;  %p1314_p8 = scmp.lt.s32.totalorder %s1312_s16, %s1308_s17 }
  0x5b   : > { %546 = vmatpush.bf16.msra.mxu1 %v1033_v5  ;;  %v1046_v38 = vld [vmem:[#allocation10 + $0x10] sm:$0xff]  ;;  %v1044_v47 = vld [vmem:[#allocation10] sm:$0xff]  ;;  %p1310_p13 = pnand %p1309_p3, %p1507_p0 }
  0x5c   : > { %v659_v46 = vld [vmem:[%s450_s18] sm:$0x1]  ;;  %p1315_p10 = por %p1314_p8, %p1313_p9 }
  0x5d   : > { %v696_v51 = vld [vmem:[%s1641_s8] sm:$0x1]  ;;  %p1311_p7 = pneg %p1310_p13 }
  0x5e   : > { %646 = vmatpush.bf16.msra.mxu3 %v1041_v16 }
  0x5f   : > { %547 = vmatpush.bf16.msra.mxu1 %v1032_v6  ;;  %p1316_p12 = pnand %p1315_p10, %p1311_p7 }
  0x62   : > { %647 = vmatpush.bf16.msra.mxu3 %v1040_v17 }
  0x63   : > { %548 = vmatpush.bf16.msra.mxu1 %v1031_v7 }
  0x66   : > { %648 = vmatpush.bf16.msra.mxu3 %v1039_v18 }
  0x67   : > { %549 = vmatpush.bf16.msra.mxu1 %v1030_v8 }
  0x6a   : > { %649 = vmatpush.bf16.msra.mxu3 %v1038_v20 }
  0x6b   : > { %550 = vmatpush.bf16.msra.mxu1 %v1029_v9 }
  0x6e   : > { %650 = vmatpush.bf16.msra.mxu3 %v1037_v23 }
  0x6f   : > { %551 = vmatpush.bf16.msra.mxu1 %v1028_v10 }
  0x72   : > { %651 = vmatpush.bf16.msra.mxu3 %v1036_v28 }
  0xd4   : > { %v471_v11 = vpop.f32.mrf.mxu0 }
  0xd5   : > { %v475_v12 = vpack.c.bf16 %v471_v11, %v471_v11 }
  0xd7   : > { %552 = vmatmul.bf16.vlgmr.msra.gmra.mxu1 %v475_v12 }
  0xdc   : > { %v473_v13 = vpop.f32.mrf.mxu0 }
 0x154   : > { %v553_v21 = vpop.f32.mrf.mxu1 }
 0x155   : > { %v554_v22 = vadd.f32 %v1136_v19, %v553_v21 }
 0x157   : > { %v557_v24 = vmax.f32 %v554_v22, 0.0 }
 0x159   : > { %v558_v25 = vpack.c.bf16 %v557_v24, %v557_v24 }
 0x15b   : > { %v560_v26 = vsel %vm458_vm0, %v558_v25, 0 }
 0x15c   : > { %v555_v27 = vpop.f32.mrf.mxu1  ;;  %569 = vmatpush.bf16.msra.mxu2 %v560_v26 }
 0x15f   : > { %960 = vmatmul.msk.bf16.vlgmr.msra.gmra.mxu2 %vm454_vm1, %v452_v3 }
 0x160   : > { %745 = vmatpush.bf16.msrb.mxu2 %v1051_v32 }
 0x164   : > { %746 = vmatpush.bf16.msrb.mxu2 %v1050_v33 }
 0x168   : > { %747 = vmatpush.bf16.msrb.mxu2 %v1049_v34 }
 0x16c   : > { %748 = vmatpush.bf16.msrb.mxu2 %v1048_v35 }
 0x170   : > { %749 = vmatpush.bf16.msrb.mxu2 %v1047_v36 }
 0x174   : > { %750 = vmatpush.bf16.msrb.mxu2 %v1046_v38 }
 0x178   : > { %751 = vmatpush.bf16.msrb.mxu2 %v1045_v41 }
 0x17c   : > { %752 = vmatpush.bf16.msrb.mxu2 %v1044_v47 }
 0x1e2   : > { %v571_v29 = vpop.f32.mrf.mxu2 }
 0x1e3   : > { %v575_v30 = vpack.c.bf16 %v571_v29, %v571_v29 }
 0x1e5   : > { %652 = vmatmul.bf16.vlgmr.msra.gmra.mxu3 %v575_v30 }
 0x1ea   : > { %v573_v31 = vpop.f32.mrf.mxu2 }
 0x268   : > { %v653_v39 = vpop.f32.mrf.mxu3 }
 0x269   : > { %v654_v40 = vadd.f32 %v1137_v37, %v653_v39 }
 0x26b   : > { %v657_v42 = vmax.f32 %v654_v40, 0.0 }
 0x26d   : > { %v658_v43 = vpack.c.bf16 %v657_v42, %v657_v42 }
 0x26f   : > { %v664_v44 = vsel %vm458_vm0, %v658_v43, 0 }
 0x270   : > { %v655_v45 = vpop.f32.mrf.mxu3  ;;  %673 = vmatpush.bf16.msrb.mxu0 %v664_v44 }
 0x273   : > { %993 = vmatmul.msk.bf16.vlgmr.msrb.gmra.mxu0 %vm454_vm1, %v659_v46 }
 0x2f0   : > { %v675_v48 = vpop.f32.mrf.mxu0 }
 0x2f1   : > { %v679_v49 = vpack.c.bf16 %v675_v48, %v675_v48 }
 0x2f3   : > { %753 = vmatmul.bf16.vlgmr.msrb.gmra.mxu2 %v679_v49 }
 0x2f8   : > { %v677_v50 = vpop.f32.mrf.mxu0 }
 0x376   : > { %v754_v52 = vpop.f32.mrf.mxu2 }
 0x377   : > { %v755_v53 = vadd.f32 %v754_v52, %v696_v51 }
 0x379   : > { %v759_v54 = vsel %vm758_vm2, %v755_v53, -inf }
 0x37a   : > { %760 = vmax.xlane.f32.xlu0 %v759_v54 }
 0x37e   : > { %v756_v55 = vpop.f32.mrf.mxu2 }
 0x3ed   : > { %v761_v56 = vpop.xlane.xlu0 %760 }
 0x3ee   : > { %v762_v57 = vsub.f32 %v755_v53, %v761_v56 }
 0x3f0   : > { %v763_v58 = vmul.f32 1.442695, %v762_v57 }
 0x3f2   : > { %1138 = vpow2.f32 %v763_v58 }
 0x3f8   : > { %v1139_v59 = vpop.eup %1138 }
 0x3f9   : > { %v765_v60 = vsel %vm758_vm2, %v1139_v59, 0.0 }
 0x3fa   : > { %766 = vadd.xlane.f32.xlu0 %v765_v60 }
 0x46d   : > { %v767_v61 = vpop.xlane.xlu0 %766 }
 0x46e   : > { %1140 = vlog2.f32 %v767_v61 }
 0x474   : > { %v1141_v62 = vpop.eup %1140 }
 0x475   : > { %v769_v63 = vmul.f32 0.6931472, %v1141_v62 }
 0x477   : > { %v770_v0 = vsub.f32 %v762_v57, %v769_v63 }
 0x479   : > { %771 = vst [vmem:[%s447_s21] sm:$0x1] %v770_v0 }
 0x47a   : > { %1319 = shalt.err (!%p1316_p12)
}
 0x47b   : > { %1068 = dma.vmem_to_hbm [thread:$0]  (%p1507_p0), %s784_s19, 16, %s786_s28, %s773_s12  }
 0x47c PF: > { %s1667_s26 = sld [smem:[#allocation18_spill]]  ;;  %s797_s29 = sand.u32 1, %s1358_s30  }
 0x47d   : > { %s798_s22 = scalar_lea.sflag [#allocation4], %s797_s29 }
 0x482   : > { %p1668_p5 = scmp.ge.s32.totalorder %s1667_s26, 2 }
 0x484   : > { %p1088_p11 = pnand %p1668_p5, %p1513_p6 }
 0x486   : > { %p1089_p2 = pneg %p1088_p11 }
 0x488   : > { %1353 = dma.done.wait (%p1089_p2), %s798_s22, 16  }
 0x489   : > { %1355 = vsyncadd (%p1089_p2), %s798_s22, 4294967280  ;;  %s1669_s12 = sld [smem:[#allocation19_spill]]  ;;  %s1672_s30 = smov %s1362_s10 }
 0x48a   : > { %s1670_s18 = sld [smem:[#allocation17_spill]] }
 0x48b   : > { %s1671_s11 = sld [smem:[#allocation20_spill]] }
 0x48f   : > { %p26_p4 = scmp.ge.s32.totalorder %s1669_s12, 4  }
 0x490   : > { %s1673_s10 = smov %s1670_s18 }
 0x491   :  { %28 = sbr.rel (!%p26_p4) target bundleno = 12 (0xc), region = 129 }
 0x496   :  { %803 = vsyncpa [#allocation3], 1 }
 0x497   :  { %805 = vsyncpa [#allocation3 + $0x1], 1 }
 0x498   :  { %806 = vsyncpa [#allocation6], 1 }
 0x499   :  { %808 = vsyncpa [#allocation6 + $0x1], 1 }
 0x49a   :  { %809 = vsyncpa [#allocation9], 1 }
 0x49b   :  { %810 = vsyncpa [#allocation4], 1 }
 0x49c   :  { %812 = vsyncpa [#allocation4 + $0x1], 1 }

</bundles_post_ra>
